<compile_context>
chip_gen: v5e
topology: v5e:2x2
jax: 0.10.0
libtpu: 0.0.40
codegen_flags: <defaults>
</compile_context>

<pallas_src>
import functools

import jax
import jax.numpy as jnp
from jax.experimental import pallas as pl
from jax.experimental.pallas import tpu as pltpu

EPS = 1e-5  # nn.BatchNorm1d default


def _round_up(x, m):
    return ((x + m - 1) // m) * m


def _resident_spec(shape):
    """BlockSpec for an array whose block never changes across the grid (kept resident in VMEM)."""
    idx_map = lambda i: (0,) * len(shape)
    try:
        return pl.BlockSpec(shape, idx_map, pipeline_mode=pl.Buffered(1))
    except TypeError:  # older API without pipeline_mode: falls back to default (double) buffering
        return pl.BlockSpec(shape, idx_map)


def residual_block_kernel(x_ref, w1_ref, w2_ref, p_ref, o_ref):
    """One batch tile: relu(x@W1+b1) -> relu(. @ W2eff + b2eff) -> *s2+t2 -> +x.

    x_ref : (TB, Dp) f32      activation tile
    w1_ref: (Dp, Dp) bf16     Linear1 weight (pre-transposed)
    w2_ref: (Dp, Dp) bf16     Linear2 weight with BN1 folded in (pre-transposed, row-scaled)
    p_ref : (4, Dp)  f32      rows = [b1, b2_eff, s2, t2]
    o_ref : (TB, Dp) f32      output tile
    """
    xb = x_ref[...].astype(jnp.bfloat16)   # bf16 operand for the MXU; f32 residual re-read later

    b1 = p_ref[0:1, :]
    b2 = p_ref[1:2, :]
    s2 = p_ref[2:3, :]
    t2 = p_ref[3:4, :]

    # ---- Linear 1 (MXU, bf16 operands, f32 accumulate) + ReLU ----
    h = jnp.dot(xb, w1_ref[...], preferred_element_type=jnp.float32) + b1
    h = jnp.maximum(h, 0.0)

    # ---- [BN1 folded into W2/b2] Linear 2 (MXU) + ReLU ----
    h = jnp.dot(h.astype(jnp.bfloat16), w2_ref[...],
                preferred_element_type=jnp.float32) + b2
    h = jnp.maximum(h, 0.0)

    # ---- BN2 folded to scale/offset; Dropout = identity (eval); residual add (re-read x tile) ----
    # TODO(synk): training-mode dropout (torch RNG) and BN batch-stat updates are not implemented.
    o_ref[...] = (h * s2 + t2 + x_ref[...]).astype(o_ref.dtype)


@functools.partial(jax.jit, static_argnames=("block_rows",))
def residual_block(x, params, *, block_rows=256):
    """x: (B, D) float32. params: dict of arrays (see init_params)."""
    B, D = x.shape
    assert block_rows % 8 == 0

    # ---------------- wrapper-side weight prep (plain JAX glue) ----------------
    # Fold BN1 into Linear2, fold BN2 into a per-feature scale/offset.
    s1 = params["bn1_gamma"] * jax.lax.rsqrt(params["bn1_var"] + EPS)
    t1 = params["bn1_beta"] - params["bn1_mean"] * s1
    s2 = params["bn2_gamma"] * jax.lax.rsqrt(params["bn2_var"] + EPS)
    t2 = params["bn2_beta"] - params["bn2_mean"] * s2

    w1_t = params["w1"].T                          # (D, D): y = x @ W1^T
    w2_eff = s1[:, None] * params["w2"].T          # BN1 scale folded into W2^T rows
    b2_eff = params["b2"] + t1 @ params["w2"].T    # BN1 shift folded into bias
    b1 = params["b1"]

    # ---------------- padding to MXU/lane-friendly shapes ----------------
    # 256-multiple feature padding fills the 2x256x256 MXUs on v6e/v7x (v5e unaffected).
    Dp = _round_up(D, 256)
    pad_d = Dp - D
    if pad_d:
        w1_t = jnp.pad(w1_t, ((0, pad_d), (0, pad_d)))
        w2_eff = jnp.pad(w2_eff, ((0, pad_d), (0, pad_d)))
        b1 = jnp.pad(b1, (0, pad_d))
        b2_eff = jnp.pad(b2_eff, (0, pad_d))
        s2 = jnp.pad(s2, (0, pad_d))
        t2 = jnp.pad(t2, (0, pad_d))

    # ---------------- batch tiling: >=2 grid steps when B allows (v7x dual-TC) ----------------
    TB = min(block_rows, _round_up(B, 8))
    B_pad = _round_up(B, TB)
    if (B_pad // TB) < 2 and B > 8:
        TB = _round_up(pl.cdiv(_round_up(B, 8), 2), 8)
        B_pad = _round_up(B, TB)
    x_p = jnp.pad(x.astype(jnp.float32), ((0, B_pad - B), (0, pad_d)))

    w1_b = w1_t.astype(jnp.bfloat16)
    w2_b = w2_eff.astype(jnp.bfloat16)
    prow = jnp.stack([b1, b2_eff, s2, t2], axis=0).astype(jnp.float32)  # (4, Dp)

    grid = (B_pad // TB,)

    # ---------------- VMEM budget (matches actual buffer counts) ----------------
    weight_bytes = 2 * Dp * Dp * 2              # two bf16 weights, single-buffered / resident
    param_bytes = 8 * Dp * 4                    # (4, Dp) f32, sublane-padded to 8 rows
    tile_bytes = 2 * (TB * Dp * 4) * 2          # x + out tiles, double-buffered (pipelined)
    scratch_bytes = 4 * TB * Dp * 4             # headroom for in-kernel f32 intermediates
    estimate = int(1.5 * (weight_bytes + param_bytes + tile_bytes + scratch_bytes)) + (2 << 20)
    try:
        vmem_cap = int(0.9 * pltpu.get_tpu_info().vmem_capacity_bytes)
    except Exception:
        vmem_cap = 56 << 20                     # safe floor: below v7x's 64 MiB physical VMEM
    vmem_limit = max(1 << 20, min(estimate, vmem_cap))

    out = pl.pallas_call(
        residual_block_kernel,
        out_shape=jax.ShapeDtypeStruct((B_pad, Dp), jnp.float32),
        grid=grid,
        in_specs=[
            pl.BlockSpec((TB, Dp), lambda i: (i, 0)),   # x: pipelined batch tiles
            _resident_spec((Dp, Dp)),                   # W1: resident, single-buffered
            _resident_spec((Dp, Dp)),                   # W2 (BN1-folded): resident, single-buffered
            _resident_spec((4, Dp)),                    # stacked per-feature rows: resident
        ],
        out_specs=pl.BlockSpec((TB, Dp), lambda i: (i, 0)),
        compiler_params=pltpu.CompilerParams(
            dimension_semantics=("parallel",),
            vmem_limit_bytes=vmem_limit,
        ),
    )(x_p, w1_b, w2_b, prow)

    return out[:B, :D]


def init_params(key, dim):
    """Deterministic params matching nn.Linear / nn.BatchNorm1d shapes & default init."""
    k1, k2, k3, k4 = jax.random.split(key, 4)
    bound = 1.0 / jnp.sqrt(dim)
    return {
        # nn.Linear(dim, dim): weight (out, in), bias (out,)
        "w1": jax.random.uniform(k1, (dim, dim), jnp.float32, -bound, bound),
        "b1": jax.random.uniform(k2, (dim,), jnp.float32, -bound, bound),
        "w2": jax.random.uniform(k3, (dim, dim), jnp.float32, -bound, bound),
        "b2": jax.random.uniform(k4, (dim,), jnp.float32, -bound, bound),
        # nn.BatchNorm1d(dim) defaults
        "bn1_gamma": jnp.ones((dim,), jnp.float32),
        "bn1_beta": jnp.zeros((dim,), jnp.float32),
        "bn1_mean": jnp.zeros((dim,), jnp.float32),
        "bn1_var": jnp.ones((dim,), jnp.float32),
        "bn2_gamma": jnp.ones((dim,), jnp.float32),
        "bn2_beta": jnp.zeros((dim,), jnp.float32),
        "bn2_mean": jnp.zeros((dim,), jnp.float32),
        "bn2_var": jnp.ones((dim,), jnp.float32),
    }


def reference(x, p):
    """Pure-JAX f32 reference of the eval-mode PyTorch forward."""
    h = jnp.maximum(x @ p["w1"].T + p["b1"], 0.0)
    h = (h - p["bn1_mean"]) / jnp.sqrt(p["bn1_var"] + EPS) * p["bn1_gamma"] + p["bn1_beta"]
    h = jnp.maximum(h @ p["w2"].T + p["b2"], 0.0)
    h = (h - p["bn2_mean"]) / jnp.sqrt(p["bn2_var"] + EPS) * p["bn2_gamma"] + p["bn2_beta"]
    return h + x


if __name__ == "__main__":
    B, D = 32, 32  # small shapes: dim = hidden size of the ResidualBlock
    key = jax.random.PRNGKey(0)
    kx, kp = jax.random.split(key)

    x = jax.random.normal(kx, (B, D), jnp.float32)
    params = init_params(kp, D)

    # block_rows=8 exercises the multi-step batch grid (grid=(4,)) at small shapes.
    out = residual_block(x, params, block_rows=8)
    out = jax.block_until_ready(out)

    ref = reference(x, params)
    assert out.shape == (B, D)
    # bf16 MXU operands with f32 accumulation => tolerance looser than pure-f32.
    assert jnp.allclose(out, ref, atol=5e-2, rtol=5e-2), "mismatch vs reference"

    # Also exercise the default large-tile path (grid auto-split so it stays >= 2 steps).
    out2 = jax.block_until_ready(residual_block(x, params))
    assert jnp.allclose(out2, ref, atol=5e-2, rtol=5e-2), "mismatch vs reference (default tiling)"

    print("KERNEL_OK")
</pallas_src>

<mosaic_0001>
module attributes {stable_mosaic.version = 11 : i64} {
  func.func @residual_block_kernel(%arg0: i32, %arg1: memref<8x256xf32, #tpu.memory_space<vmem>>, %arg2: memref<256x256xbf16, #tpu.memory_space<vmem>>, %arg3: memref<256x256xbf16, #tpu.memory_space<vmem>>, %arg4: memref<4x256xf32, #tpu.memory_space<vmem>>, %arg5: memref<8x256xf32, #tpu.memory_space<vmem>>) attributes {dimension_semantics = [#tpu.dimension_semantics<parallel>], iteration_bounds = array<i64: 4>, scalar_prefetch = 0 : i64, scratch_operands = 0 : i64, tpu.core_type = #tpu.core_type<tc>, window_params = [{transform_indices = @transform_0, window_bounds = array<i64: 8, 256>}, {pipeline_mode = #tpu.pipeline_mode<synchronous>, transform_indices = @transform_1, window_bounds = array<i64: 256, 256>}, {pipeline_mode = #tpu.pipeline_mode<synchronous>, transform_indices = @transform_2, window_bounds = array<i64: 256, 256>}, {pipeline_mode = #tpu.pipeline_mode<synchronous>, transform_indices = @transform_3, window_bounds = array<i64: 4, 256>}, {transform_indices = @transform_4, window_bounds = array<i64: 8, 256>}]} {
    %c0 = arith.constant 0 : index
    %c0_0 = arith.constant 0 : index
    %0 = vector.load %arg1[%c0, %c0_0] : memref<8x256xf32, #tpu.memory_space<vmem>>, vector<8x256xf32>
    %1 = arith.truncf %0 : vector<8x256xf32> to vector<8x256xbf16>
    %c0_1 = arith.constant 0 : index
    %c0_2 = arith.constant 0 : index
    %2 = vector.load %arg4[%c0_1, %c0_2] : memref<4x256xf32, #tpu.memory_space<vmem>>, vector<1x256xf32>
    %c1 = arith.constant 1 : index
    %c0_3 = arith.constant 0 : index
    %3 = vector.load %arg4[%c1, %c0_3] : memref<4x256xf32, #tpu.memory_space<vmem>>, vector<1x256xf32>
    %c2 = arith.constant 2 : index
    %c0_4 = arith.constant 0 : index
    %4 = vector.load %arg4[%c2, %c0_4] : memref<4x256xf32, #tpu.memory_space<vmem>>, vector<1x256xf32>
    %c3 = arith.constant 3 : index
    %c0_5 = arith.constant 0 : index
    %5 = vector.load %arg4[%c3, %c0_5] : memref<4x256xf32, #tpu.memory_space<vmem>>, vector<1x256xf32>
    %c0_6 = arith.constant 0 : index
    %c0_7 = arith.constant 0 : index
    %6 = vector.load %arg2[%c0_6, %c0_7] : memref<256x256xbf16, #tpu.memory_space<vmem>>, vector<256x256xbf16>
    %cst = arith.constant dense<0.000000e+00> : vector<8x256xf32>
    %7 = tpu.matmul %1, %6, %cst {dimension_numbers = #tpu.dot_dimension_numbers<[1], [0], [0], [1], [0, 0, 1, 1], [], []>} : vector<8x256xbf16>, vector<256x256xbf16>, vector<8x256xf32> -> vector<8x256xf32>
    %8 = vector.broadcast %2 : vector<1x256xf32> to vector<8x256xf32>
    %9 = arith.addf %7, %8 : vector<8x256xf32>
    %cst_8 = arith.constant 0.000000e+00 : f32
    %10 = vector.broadcast %cst_8 : f32 to vector<8x256xf32>
    %11 = arith.maximumf %9, %10 : vector<8x256xf32>
    %12 = arith.truncf %11 : vector<8x256xf32> to vector<8x256xbf16>
    %c0_9 = arith.constant 0 : index
    %c0_10 = arith.constant 0 : index
    %13 = vector.load %arg3[%c0_9, %c0_10] : memref<256x256xbf16, #tpu.memory_space<vmem>>, vector<256x256xbf16>
    %cst_11 = arith.constant dense<0.000000e+00> : vector<8x256xf32>
    %14 = tpu.matmul %12, %13, %cst_11 {dimension_numbers = #tpu.dot_dimension_numbers<[1], [0], [0], [1], [0, 0, 1, 1], [], []>} : vector<8x256xbf16>, vector<256x256xbf16>, vector<8x256xf32> -> vector<8x256xf32>
    %15 = vector.broadcast %3 : vector<1x256xf32> to vector<8x256xf32>
    %16 = arith.addf %14, %15 : vector<8x256xf32>
    %cst_12 = arith.constant 0.000000e+00 : f32
    %17 = vector.broadcast %cst_12 : f32 to vector<8x256xf32>
    %18 = arith.maximumf %16, %17 : vector<8x256xf32>
    %19 = vector.broadcast %4 : vector<1x256xf32> to vector<8x256xf32>
    %20 = arith.mulf %18, %19 : vector<8x256xf32>
    %21 = vector.broadcast %5 : vector<1x256xf32> to vector<8x256xf32>
    %22 = arith.addf %20, %21 : vector<8x256xf32>
    %c0_13 = arith.constant 0 : index
    %c0_14 = arith.constant 0 : index
    %23 = vector.load %arg1[%c0_13, %c0_14] : memref<8x256xf32, #tpu.memory_space<vmem>>, vector<8x256xf32>
    %24 = arith.addf %22, %23 : vector<8x256xf32>
    %c0_15 = arith.constant 0 : index
    %c0_16 = arith.constant 0 : index
    %25 = vector.load %arg5[%c0_15, %c0_16] : memref<8x256xf32, #tpu.memory_space<vmem>>, vector<8x256xf32>
    tpu.vector_store %arg5[%c0_15, %c0_16], %24 {strides = array<i32>} : memref<8x256xf32, #tpu.memory_space<vmem>>, vector<8x256xf32>,
    return
  }
  func.func @transform_0(%arg0: i32) -> (i32, i32) {
    %c0_i32 = arith.constant 0 : i32
    %c0_i32_0 = arith.constant 0 : i32
    return %arg0, %c0_i32 : i32, i32
  }
  func.func @transform_1(%arg0: i32) -> (i32, i32) {
    %c0_i32 = arith.constant 0 : i32
    %c0_i32_0 = arith.constant 0 : i32
    %c0_i32_1 = arith.constant 0 : i32
    return %c0_i32, %c0_i32_0 : i32, i32
  }
  func.func @transform_2(%arg0: i32) -> (i32, i32) {
    %c0_i32 = arith.constant 0 : i32
    %c0_i32_0 = arith.constant 0 : i32
    %c0_i32_1 = arith.constant 0 : i32
    return %c0_i32, %c0_i32_0 : i32, i32
  }
  func.func @transform_3(%arg0: i32) -> (i32, i32) {
    %c0_i32 = arith.constant 0 : i32
    %c0_i32_0 = arith.constant 0 : i32
    %c0_i32_1 = arith.constant 0 : i32
    return %c0_i32, %c0_i32_0 : i32, i32
  }
  func.func @transform_4(%arg0: i32) -> (i32, i32) {
    %c0_i32 = arith.constant 0 : i32
    %c0_i32_0 = arith.constant 0 : i32
    return %arg0, %c0_i32 : i32, i32
  }
}

</mosaic_0001>

<bundles_post_ra>
// kernel: residual_block.1
= control target key start
LH: loop header
LB: loop body
LE: loop exit
PB: predicated region body
PF: predicated region fallthrough
CT: control target
= control target key end

     0   :  { %s1163_s15 = smov 0   ;;  %s1597_s0 = inlined_call_operand.vmem [shape: f32[32,256], index: 0, kind: input, shape index: {}]   ;;  %s1598_s1 = inlined_call_operand.vmem [shape: bf16[256,256], index: 1, kind: input, shape index: {}]   ;;  %s1599_s2 = inlined_call_operand.vmem [shape: bf16[256,256], index: 2, kind: input, shape index: {}]   ;;  %s1600_s3 = inlined_call_operand.vmem [shape: f32[4,256], index: 3, kind: input, shape index: {}]   ;;  %s1601_s4 = inlined_call_operand.vmem [shape: f32[32,256], index: 4, kind: output, shape index: {}]  }
   0x1 LB: > { %s786_s16 = sadd.s32 4294967295, %s1136_s15   ;;  %p790_p0 = scmp.ge.s32.totalorder %s1136_s15, 1  ;;  %s1136_s15 = sphi %s1163_s15, %s14_s15  }
   0x2   : > { %p162_p1 = scmp.lt.s32.totalorder %s1136_s15, 5 }
   0x4   : > { %p163_p2 = pnand %p790_p0, %p162_p1 }
   0x5   : > { %p188_p3 = scmp.lt.s32.totalorder (!%p163_p2), %s786_s16, 3 }
   0x6   : > { %166 = sbr.rel (%p163_p2) target bundleno = 331 (0x14b), region = 36 }
   0xb   : > { %v856_v0 = vld [vmem:[%s1598_s1 + $0x70] sm:$0xf]  ;;  %v1073_v1 = vld [vmem:[%s1598_s1 + $0x74] sm:$0xf0]  ;;  %v1072_v5 = vld [vmem:[%s1598_s1 + $0x74] sm:$0xf] }
   0xc   : > { %v920_v2 = vld [vmem:[%s1598_s1 + $0xf0] sm:$0xf]  ;;  %v857_v3 = vor.u32 %v1073_v1, %v856_v0  ;;  %v1089_v4 = vld [vmem:[%s1598_s1 + $0xf4] sm:$0xf0]  ;;  %v858_v6 = vld [vmem:[%s1598_s1 + $0x78] sm:$0xf0] }
   0xd   : > { %v921_v7 = vor.u32 %v1089_v4, %v920_v2  ;;  %v861_v8 = vor.u32 %v1072_v5, %v858_v6  ;;  %v1088_v9 = vld [vmem:[%s1598_s1 + $0xf4] sm:$0xf]  ;;  %v922_v10 = vld [vmem:[%s1598_s1 + $0xf8] sm:$0xf0]  ;;  %v848_v11 = vld [vmem:[%s1598_s1 + $0x60] sm:$0xf] }
   0xe   : > { %406 = vmatpush.bf16.msra.mxu0 %v857_v3  ;;  %v925_v12 = vor.u32 %v1088_v9, %v922_v10  ;;  %v1071_v13 = vld [vmem:[%s1598_s1 + $0x64] sm:$0xf0]  ;;  %v912_v14 = vld [vmem:[%s1598_s1 + $0xe0] sm:$0xf]  ;;  %v1070_v18 = vld [vmem:[%s1598_s1 + $0x64] sm:$0xf] }
   0xf   : > { %v1087_v15 = vld [vmem:[%s1598_s1 + $0xe4] sm:$0xf0]  ;;  %419 = vmatpush.bf16.msra.mxu1 %v921_v7  ;;  %432 = vmatpush.bf16.msra.mxu2 %v861_v8  ;;  %v849_v16 = vor.u32 %v1071_v13, %v848_v11  ;;  %v850_v19 = vld [vmem:[%s1598_s1 + $0x68] sm:$0xf0]  ;;  %v1086_v20 = vld [vmem:[%s1598_s1 + $0xe4] sm:$0xf] }
  0x10   : > { %v913_v17 = vor.u32 %v1087_v15, %v912_v14  ;;  %445 = vmatpush.bf16.msra.mxu3 %v925_v12  ;;  %v853_v21 = vor.u32 %v1070_v18, %v850_v19  ;;  %v914_v22 = vld [vmem:[%s1598_s1 + $0xe8] sm:$0xf0]  ;;  %v840_v23 = vld [vmem:[%s1598_s1 + $0x50] sm:$0xf]  ;;  %v1069_v24 = vld [vmem:[%s1598_s1 + $0x54] sm:$0xf0] }
  0x11   : > { %v917_v25 = vor.u32 %v1086_v20, %v914_v22  ;;  %v904_v26 = vld [vmem:[%s1598_s1 + $0xd0] sm:$0xf]  ;;  %v1085_v27 = vld [vmem:[%s1598_s1 + $0xd4] sm:$0xf0]  ;;  %v1068_v28 = vld [vmem:[%s1598_s1 + $0x54] sm:$0xf]  ;;  %v841_v29 = vor.u32 %v1069_v24, %v840_v23 }
  0x12   : > { %407 = vmatpush.bf16.msra.mxu0 %v849_v16  ;;  %v842_v30 = vld [vmem:[%s1598_s1 + $0x58] sm:$0xf0]  ;;  %v1084_v31 = vld [vmem:[%s1598_s1 + $0xd4] sm:$0xf]  ;;  %v905_v33 = vor.u32 %v1085_v27, %v904_v26  ;;  %v832_v35 = vld [vmem:[%s1598_s1 + $0x40] sm:$0xf] }
  0x13   : > { %v906_v32 = vld [vmem:[%s1598_s1 + $0xd8] sm:$0xf0]  ;;  %420 = vmatpush.bf16.msra.mxu1 %v913_v17  ;;  %433 = vmatpush.bf16.msra.mxu2 %v853_v21  ;;  %v845_v34 = vor.u32 %v1068_v28, %v842_v30  ;;  %v1067_v36 = vld [vmem:[%s1598_s1 + $0x44] sm:$0xf0]  ;;  %v896_v37 = vld [vmem:[%s1598_s1 + $0xc0] sm:$0xf] }
  0x14   : > { %446 = vmatpush.bf16.msra.mxu3 %v917_v25  ;;  %v909_v38 = vor.u32 %v1084_v31, %v906_v32  ;;  %v1083_v39 = vld [vmem:[%s1598_s1 + $0xc4] sm:$0xf0]  ;;  %v1066_v40 = vld [vmem:[%s1598_s1 + $0x44] sm:$0xf]  ;;  %v834_v41 = vld [vmem:[%s1598_s1 + $0x48] sm:$0xf0]  ;;  %v833_v44 = vor.u32 %v1067_v36, %v832_v35 }
  0x15   : > { %v1082_v42 = vld [vmem:[%s1598_s1 + $0xc4] sm:$0xf]  ;;  %v898_v43 = vld [vmem:[%s1598_s1 + $0xc8] sm:$0xf0]  ;;  %v897_v45 = vor.u32 %v1083_v39, %v896_v37  ;;  %v837_v46 = vor.u32 %v1066_v40, %v834_v41  ;;  %v824_v47 = vld [vmem:[%s1598_s1 + $0x30] sm:$0xf] }
  0x16   : > { %408 = vmatpush.bf16.msra.mxu0 %v841_v29  ;;  %v1065_v48 = vld [vmem:[%s1598_s1 + $0x34] sm:$0xf0]  ;;  %v888_v49 = vld [vmem:[%s1598_s1 + $0xb0] sm:$0xf]  ;;  %v901_v50 = vor.u32 %v1082_v42, %v898_v43  ;;  %v1064_v52 = vld [vmem:[%s1598_s1 + $0x34] sm:$0xf] }
  0x17   : > { %421 = vmatpush.bf16.msra.mxu1 %v905_v33  ;;  %434 = vmatpush.bf16.msra.mxu2 %v845_v34  ;;  %v1081_v51 = vld [vmem:[%s1598_s1 + $0xb4] sm:$0xf0]  ;;  %v826_v53 = vld [vmem:[%s1598_s1 + $0x38] sm:$0xf0]  ;;  %v1080_v54 = vld [vmem:[%s1598_s1 + $0xb4] sm:$0xf]  ;;  %v825_v56 = vor.u32 %v1065_v48, %v824_v47 }
  0x18   : > { %447 = vmatpush.bf16.msra.mxu3 %v909_v38  ;;  %v890_v55 = vld [vmem:[%s1598_s1 + $0xb8] sm:$0xf0]  ;;  %v889_v57 = vor.u32 %v1081_v51, %v888_v49  ;;  %v829_v58 = vor.u32 %v1064_v52, %v826_v53  ;;  %v816_v59 = vld [vmem:[%s1598_s1 + $0x20] sm:$0xf]  ;;  %v1063_v60 = vld [vmem:[%s1598_s1 + $0x24] sm:$0xf0] }
  0x19   : > { %v880_v61 = vld [vmem:[%s1598_s1 + $0xa0] sm:$0xf]  ;;  %v893_v62 = vor.u32 %v1080_v54, %v890_v55  ;;  %v1079_v63 = vld [vmem:[%s1598_s1 + $0xa4] sm:$0xf0]  ;;  %v1062_v0 = vld [vmem:[%s1598_s1 + $0x24] sm:$0xf]  ;;  %v817_v4 = vor.u32 %v1063_v60, %v816_v59 }
  0x1a   : > { %409 = vmatpush.bf16.msra.mxu0 %v833_v44  ;;  %v818_v1 = vld [vmem:[%s1598_s1 + $0x28] sm:$0xf0]  ;;  %v1078_v2 = vld [vmem:[%s1598_s1 + $0xa4] sm:$0xf]  ;;  %v808_v5 = vld [vmem:[%s1598_s1 + $0x10] sm:$0xf]  ;;  %v881_v6 = vor.u32 %v1079_v63, %v880_v61 }
  0x1b   : > { %422 = vmatpush.bf16.msra.mxu1 %v897_v45  ;;  %435 = vmatpush.bf16.msra.mxu2 %v837_v46  ;;  %v882_v3 = vld [vmem:[%s1598_s1 + $0xa8] sm:$0xf0]  ;;  %v821_v7 = vor.u32 %v1062_v0, %v818_v1  ;;  %v1061_v8 = vld [vmem:[%s1598_s1 + $0x14] sm:$0xf0]  ;;  %v872_v9 = vld [vmem:[%s1598_s1 + $0x90] sm:$0xf] }
  0x1c   : > { %448 = vmatpush.bf16.msra.mxu3 %v901_v50  ;;  %v1077_v10 = vld [vmem:[%s1598_s1 + $0x94] sm:$0xf0]  ;;  %v885_v11 = vor.u32 %v1078_v2, %v882_v3  ;;  %v1060_v12 = vld [vmem:[%s1598_s1 + $0x14] sm:$0xf]  ;;  %v810_v13 = vld [vmem:[%s1598_s1 + $0x18] sm:$0xf0]  ;;  %v809_v16 = vor.u32 %v1061_v8, %v808_v5 }
  0x1d   : > { %v1076_v14 = vld [vmem:[%s1598_s1 + $0x94] sm:$0xf]  ;;  %v874_v15 = vld [vmem:[%s1598_s1 + $0x98] sm:$0xf0]  ;;  %v800_v17 = vld [vmem:[%s1598_s1] sm:$0xf]  ;;  %v873_v19 = vor.u32 %v1077_v10, %v872_v9  ;;  %v813_v20 = vor.u32 %v1060_v12, %v810_v13 }
  0x1e   : > { %410 = vmatpush.bf16.msra.mxu0 %v825_v56  ;;  %v1059_v18 = vld [vmem:[%s1598_s1 + $0x4] sm:$0xf0]  ;;  %s1603_s16 = smov (!%p188_p3, %s786_s16), 3  ;;  %v864_v21 = vld [vmem:[%s1598_s1 + $0x80] sm:$0xf]  ;;  %v877_v24 = vor.u32 %v1076_v14, %v874_v15 }
  0x1f   : > { %423 = vmatpush.bf16.msra.mxu1 %v889_v57  ;;  %436 = vmatpush.bf16.msra.mxu2 %v829_v58  ;;  %v1075_v22 = vld [vmem:[%s1598_s1 + $0x84] sm:$0xf0]  ;;  %v1058_v23 = vld [vmem:[%s1598_s1 + $0x4] sm:$0xf]  ;;  %v802_v25 = vld [vmem:[%s1598_s1 + $0x8] sm:$0xf0]  ;;  %v801_v30 = vor.u32 %v1059_v18, %v800_v17 }
  0x20   : > { %449 = vmatpush.bf16.msra.mxu3 %v893_v62  ;;  %v1074_v26 = vld [vmem:[%s1598_s1 + $0x84] sm:$0xf]  ;;  %s1056_s23 = sshll.u32 %s1603_s16, 4  ;;  %v866_v27 = vld [vmem:[%s1598_s1 + $0x88] sm:$0xf0]  ;;  %v865_v34 = vor.u32 %v1075_v22, %v864_v21  ;;  %v805_v35 = vor.u32 %v1058_v23, %v802_v25 }
  0x21   : > { %s192_s28 = scalar_lea.vmem %s1597_s0, %s1056_s23  ;;  %v984_v28 = vld [vmem:[%s1599_s2 + $0x70] sm:$0xf]  ;;  %v1105_v29 = vld [vmem:[%s1599_s2 + $0x74] sm:$0xf0]  ;;  %v1104_v32 = vld [vmem:[%s1599_s2 + $0x74] sm:$0xf]  ;;  %v869_v37 = vor.u32 %v1074_v26, %v866_v27  ;;  %s197_s29 = scalar_lea.vmem %s1601_s4, %s1056_s23 }
  0x22   : > { %411 = vmatpush.bf16.msra.mxu0 %v817_v4  ;;  %v1381_v31 = vld [vmem:[%s192_s28] sm:$0xff]  ;;  %v986_v33 = vld [vmem:[%s1599_s2 + $0x78] sm:$0xf0]  ;;  %v1389_v36 = vld [vmem:[%s192_s28 + $0x8] sm:$0xff]  ;;  %v985_v38 = vor.u32 %v1105_v29, %v984_v28 }
  0x23   : > { %424 = vmatpush.bf16.msra.mxu1 %v881_v6  ;;  %437 = vmatpush.bf16.msra.mxu2 %v821_v7  ;;  %v976_v39 = vld [vmem:[%s1599_s2 + $0x60] sm:$0xf]  ;;  %v1048_v40 = vld [vmem:[%s1599_s2 + $0xf0] sm:$0xf]  ;;  %v1121_v41 = vld [vmem:[%s1599_s2 + $0xf4] sm:$0xf0]  ;;  %v200_v42 = vpack.c.bf16 %v1381_v31, %v1381_v31  ;;  %v989_v43 = vor.u32 %v1104_v32, %v986_v33  ;;  %v201_v47 = vpack.c.bf16 %v1389_v36, %v1389_v36 }
  0x24   : > { %450 = vmatpush.bf16.msra.mxu3 %v885_v11  ;;  %v1103_v44 = vld [vmem:[%s1599_s2 + $0x64] sm:$0xf0]  ;;  %v1120_v45 = vld [vmem:[%s1599_s2 + $0xf4] sm:$0xf]  ;;  %v1050_v46 = vld [vmem:[%s1599_s2 + $0xf8] sm:$0xf0]  ;;  %v1049_v50 = vor.u32 %v1121_v41, %v1048_v40 }
  0x25   : > { %v1102_v48 = vld [vmem:[%s1599_s2 + $0x64] sm:$0xf]  ;;  %v978_v49 = vld [vmem:[%s1599_s2 + $0x68] sm:$0xf0]  ;;  %v977_v51 = vor.u32 %v1103_v44, %v976_v39  ;;  %v1053_v52 = vor.u32 %v1120_v45, %v1050_v46  ;;  %v968_v53 = vld [vmem:[%s1599_s2 + $0x50] sm:$0xf] }
  0x26   : > { %412 = vmatpush.bf16.msra.mxu0 %v809_v16  ;;  %v1040_v54 = vld [vmem:[%s1599_s2 + $0xe0] sm:$0xf]  ;;  %v1119_v55 = vld [vmem:[%s1599_s2 + $0xe4] sm:$0xf0]  ;;  %v981_v56 = vor.u32 %v1102_v48, %v978_v49  ;;  %v1101_v57 = vld [vmem:[%s1599_s2 + $0x54] sm:$0xf0] }
  0x27   : > { %425 = vmatpush.bf16.msra.mxu1 %v873_v19  ;;  %438 = vmatpush.bf16.msra.mxu2 %v813_v20  ;;  %v1118_v58 = vld [vmem:[%s1599_s2 + $0xe4] sm:$0xf]  ;;  %v1042_v59 = vld [vmem:[%s1599_s2 + $0xe8] sm:$0xf0]  ;;  %v1100_v60 = vld [vmem:[%s1599_s2 + $0x54] sm:$0xf]  ;;  %v1041_v62 = vor.u32 %v1119_v55, %v1040_v54  ;;  %v969_v63 = vor.u32 %v1101_v57, %v968_v53 }
  0x28   : > { %451 = vmatpush.bf16.msra.mxu3 %v877_v24  ;;  %v970_v61 = vld [vmem:[%s1599_s2 + $0x58] sm:$0xf0]  ;;  %v1045_v0 = vor.u32 %v1118_v58, %v1042_v59  ;;  %v960_v1 = vld [vmem:[%s1599_s2 + $0x40] sm:$0xf]  ;;  %v1032_v2 = vld [vmem:[%s1599_s2 + $0xd0] sm:$0xf] }
  0x29   : > { %v1117_v3 = vld [vmem:[%s1599_s2 + $0xd4] sm:$0xf0]  ;;  %v973_v4 = vor.u32 %v1100_v60, %v970_v61  ;;  %v1099_v5 = vld [vmem:[%s1599_s2 + $0x44] sm:$0xf0]  ;;  %v1116_v6 = vld [vmem:[%s1599_s2 + $0xd4] sm:$0xf] }
  0x2a   : > { %413 = vmatpush.bf16.msra.mxu0 %v801_v30  ;;  %v1034_v7 = vld [vmem:[%s1599_s2 + $0xd8] sm:$0xf0]  ;;  %v1098_v8 = vld [vmem:[%s1599_s2 + $0x44] sm:$0xf]  ;;  %v962_v9 = vld [vmem:[%s1599_s2 + $0x48] sm:$0xf0]  ;;  %v1033_v10 = vor.u32 %v1117_v3, %v1032_v2  ;;  %v961_v11 = vor.u32 %v1099_v5, %v960_v1 }
  0x2b   : > { %426 = vmatpush.bf16.msra.mxu1 %v865_v34  ;;  %439 = vmatpush.bf16.msra.mxu2 %v805_v35  ;;  %v1037_v12 = vor.u32 %v1116_v6, %v1034_v7  ;;  %v952_v13 = vld [vmem:[%s1599_s2 + $0x30] sm:$0xf]  ;;  %v1024_v14 = vld [vmem:[%s1599_s2 + $0xc0] sm:$0xf]  ;;  %v1115_v15 = vld [vmem:[%s1599_s2 + $0xc4] sm:$0xf0]  ;;  %v965_v16 = vor.u32 %v1098_v8, %v962_v9 }
  0x2c   : > { %452 = vmatpush.bf16.msra.mxu3 %v869_v37  ;;  %v1097_v17 = vld [vmem:[%s1599_s2 + $0x34] sm:$0xf0]  ;;  %v1114_v18 = vld [vmem:[%s1599_s2 + $0xc4] sm:$0xf]  ;;  %v1026_v19 = vld [vmem:[%s1599_s2 + $0xc8] sm:$0xf0]  ;;  %v1025_v22 = vor.u32 %v1115_v15, %v1024_v14 }
  0x2d   : > { %414 = vmatmul.bf16.vlgmr.msra.gmra.mxu0 %v200_v42  ;;  %v1096_v20 = vld [vmem:[%s1599_s2 + $0x34] sm:$0xf]  ;;  %v954_v21 = vld [vmem:[%s1599_s2 + $0x38] sm:$0xf0]  ;;  %v953_v23 = vor.u32 %v1097_v17, %v952_v13  ;;  %v1029_v24 = vor.u32 %v1114_v18, %v1026_v19  ;;  %v944_v26 = vld [vmem:[%s1599_s2 + $0x20] sm:$0xf] }
  0x2e   : > { %659 = vmatpush.bf16.msrb.mxu0 %v985_v38  ;;  %427 = vmatmul.bf16.vlgmr.msra.gmra.mxu1 %v201_v47  ;;  %v957_v25 = vor.u32 %v1096_v20, %v954_v21  ;;  %v1095_v27 = vld [vmem:[%s1599_s2 + $0x24] sm:$0xf0]  ;;  %v1094_v28 = vld [vmem:[%s1599_s2 + $0x24] sm:$0xf]  ;;  %v946_v29 = vld [vmem:[%s1599_s2 + $0x28] sm:$0xf0] }
  0x2f   : > { %685 = vmatpush.bf16.msrb.mxu2 %v989_v43  ;;  %453 = vmatmul.bf16.vlgmr.msra.gmra.mxu3 %v201_v47  ;;  %v945_v30 = vor.u32 %v1095_v27, %v944_v26  ;;  %v949_v32 = vor.u32 %v1094_v28, %v946_v29  ;;  %v1016_v33 = vld [vmem:[%s1599_s2 + $0xb0] sm:$0xf]  ;;  %v1113_v34 = vld [vmem:[%s1599_s2 + $0xb4] sm:$0xf0]  ;;  %v1112_v35 = vld [vmem:[%s1599_s2 + $0xb4] sm:$0xf] }
  0x30   : > { %440 = vmatmul.bf16.vlgmr.msra.gmra.mxu2 %v200_v42  ;;  %672 = vmatpush.bf16.msrb.mxu1 %v1049_v50  ;;  %v1017_v37 = vor.u32 %v1113_v34, %v1016_v33  ;;  %v1018_v38 = vld [vmem:[%s1599_s2 + $0xb8] sm:$0xf0]  ;;  %v936_v40 = vld [vmem:[%s1599_s2 + $0x10] sm:$0xf]  ;;  %v1093_v41 = vld [vmem:[%s1599_s2 + $0x14] sm:$0xf0] }
  0x31   : > { %698 = vmatpush.bf16.msrb.mxu3 %v1053_v52  ;;  %v1021_v39 = vor.u32 %v1112_v35, %v1018_v38  ;;  %v1092_v42 = vld [vmem:[%s1599_s2 + $0x14] sm:$0xf]  ;;  %v937_v43 = vor.u32 %v1093_v41, %v936_v40  ;;  %v938_v44 = vld [vmem:[%s1599_s2 + $0x18] sm:$0xf0]  ;;  %v1008_v46 = vld [vmem:[%s1599_s2 + $0xa0] sm:$0xf] }
  0x32   : > { %660 = vmatpush.bf16.msrb.mxu0 %v977_v51  ;;  %v941_v45 = vor.u32 %v1092_v42, %v938_v44  ;;  %v1111_v47 = vld [vmem:[%s1599_s2 + $0xa4] sm:$0xf0]  ;;  %v1110_v48 = vld [vmem:[%s1599_s2 + $0xa4] sm:$0xf]  ;;  %v1010_v50 = vld [vmem:[%s1599_s2 + $0xa8] sm:$0xf0] }
  0x33   : > { %686 = vmatpush.bf16.msrb.mxu2 %v981_v56  ;;  %v1009_v49 = vor.u32 %v1111_v47, %v1008_v46  ;;  %v1013_v51 = vor.u32 %v1110_v48, %v1010_v50  ;;  %v928_v52 = vld [vmem:[%s1599_s2] sm:$0xf]  ;;  %v1091_v53 = vld [vmem:[%s1599_s2 + $0x4] sm:$0xf0]  ;;  %v1090_v54 = vld [vmem:[%s1599_s2 + $0x4] sm:$0xf] }
  0x34   : > { %673 = vmatpush.bf16.msrb.mxu1 %v1041_v62  ;;  %v929_v55 = vor.u32 %v1091_v53, %v928_v52  ;;  %v930_v56 = vld [vmem:[%s1599_s2 + $0x8] sm:$0xf0]  ;;  %v1000_v58 = vld [vmem:[%s1599_s2 + $0x90] sm:$0xf]  ;;  %v1109_v59 = vld [vmem:[%s1599_s2 + $0x94] sm:$0xf0] }
  0x35   : > { %699 = vmatpush.bf16.msrb.mxu3 %v1045_v0  ;;  %v933_v57 = vor.u32 %v1090_v54, %v930_v56  ;;  %v1001_v60 = vor.u32 %v1109_v59, %v1000_v58  ;;  %v1108_v61 = vld [vmem:[%s1599_s2 + $0x94] sm:$0xf]  ;;  %v1002_v62 = vld [vmem:[%s1599_s2 + $0x98] sm:$0xf0]  ;;  %v992_v0 = vld [vmem:[%s1599_s2 + $0x80] sm:$0xf] }
  0x36   : > { %661 = vmatpush.bf16.msrb.mxu0 %v969_v63  ;;  %v1005_v63 = vor.u32 %v1108_v61, %v1002_v62  ;;  %v1107_v1 = vld [vmem:[%s1599_s2 + $0x84] sm:$0xf0]  ;;  %v1106_v2 = vld [vmem:[%s1599_s2 + $0x84] sm:$0xf] }
  0x37   : > { %687 = vmatpush.bf16.msrb.mxu2 %v973_v4  ;;  %v993_v3 = vor.u32 %v1107_v1, %v992_v0  ;;  %v994_v4 = vld [vmem:[%s1599_s2 + $0x88] sm:$0xf0]  ;;  %v202_v6 = vld [vmem:[%s1600_s3] ss:$4 sm:$0x3] }
  0x38   : > { %674 = vmatpush.bf16.msrb.mxu1 %v1033_v10  ;;  %v997_v5 = vor.u32 %v1106_v2, %v994_v4  ;;  %v242_v7 = vperm.slane %v202_v6, 0  ;;  %v796_v29 = vld [vmem:[%s1600_s3 + $0x2] ss:$4 sm:$0x3] }
  0x39   : > { %700 = vmatpush.bf16.msrb.mxu3 %v1037_v12  ;;  %v243_v12 = vperm.slane %v202_v6, 1  ;;  %v797_v33 = vld [vmem:[%s1600_s3 + $0x3] ss:$4 sm:$0x3]  ;;  %v715_v46 = vperm.slane %v796_v29, 1 }
  0x3a   : > { %662 = vmatpush.bf16.msrb.mxu0 %v961_v11  ;;  %v721_v40 = vperm.slane %v797_v33, 0 }
  0x3b   : > { %688 = vmatpush.bf16.msrb.mxu2 %v965_v16 }
  0x3c   : > { %675 = vmatpush.bf16.msrb.mxu1 %v1025_v22 }
  0x3d   : > { %701 = vmatpush.bf16.msrb.mxu3 %v1029_v24 }
  0x3e   : > { %663 = vmatpush.bf16.msrb.mxu0 %v953_v23 }
  0x3f   : > { %689 = vmatpush.bf16.msrb.mxu2 %v957_v25  ;;  %v795_v25 = vld [vmem:[%s1600_s3 + $0x1] ss:$4 sm:$0x3] }
  0x40   : > { %676 = vmatpush.bf16.msrb.mxu1 %v1017_v37  ;;  %v495_v26 = vperm.slane %v795_v25, 0  ;;  %v714_v37 = vperm.slane %v796_v29, 0 }
  0x41   : > { %702 = vmatpush.bf16.msrb.mxu3 %v1021_v39 }
  0x42   : > { %664 = vmatpush.bf16.msrb.mxu0 %v945_v30  ;;  %v496_v30 = vperm.slane %v795_v25, 1 }
  0x43   : > { %690 = vmatpush.bf16.msrb.mxu2 %v949_v32 }
  0x44   : > { %677 = vmatpush.bf16.msrb.mxu1 %v1009_v49 }
  0x45   : > { %703 = vmatpush.bf16.msrb.mxu3 %v1013_v51  ;;  %v722_v51 = vperm.slane %v797_v33, 1 }
  0x46   : > { %665 = vmatpush.bf16.msrb.mxu0 %v937_v43 }
  0x47   : > { %691 = vmatpush.bf16.msrb.mxu2 %v941_v45 }
  0x48   : > { %678 = vmatpush.bf16.msrb.mxu1 %v1001_v60 }
  0x49   : > { %704 = vmatpush.bf16.msrb.mxu3 %v1005_v63 }
  0x4a   : > { %666 = vmatpush.bf16.msrb.mxu0 %v929_v55 }
  0x4b   : > { %692 = vmatpush.bf16.msrb.mxu2 %v933_v57 }
  0x4c   : > { %679 = vmatpush.bf16.msrb.mxu1 %v993_v3 }
  0x4d   : > { %705 = vmatpush.bf16.msrb.mxu3 %v997_v5 }
  0xaa   : > { %v415_v8 = vpop.f32.mrf.mxu0 }
  0xab   : > { %v416_v9 = vadd.f32 %v415_v8, %v242_v7  ;;  %v428_v10 = vpop.f32.mrf.mxu1 }
  0xad   : > { %v429_v11 = vadd.f32 %v428_v10, %v416_v9 }
  0xaf   : > { %v458_v13 = vmax.f32 %v429_v11, 0.0 }
  0xb1   : > { %v460_v14 = vpack.c.bf16 %v458_v13, %v458_v13 }
  0xb2   : > { %v454_v17 = vpop.f32.mrf.mxu3  ;;  %v417_v18 = vpop.f32.mrf.mxu0 }
  0xb3   : > { %v441_v15 = vpop.f32.mrf.mxu2  ;;  %v430_v19 = vpop.f32.mrf.mxu1  ;;  %667 = vmatmul.bf16.vlgmr.msrb.gmra.mxu0 %v460_v14  ;;  %693 = vmatmul.bf16.vlgmr.msrb.gmra.mxu2 %v460_v14 }
  0xb4   : > { %v442_v16 = vadd.f32 %v441_v15, %v243_v12 }
  0xb6   : > { %v455_v20 = vadd.f32 %v454_v17, %v442_v16 }
  0xb8   : > { %v459_v21 = vmax.f32 %v455_v20, 0.0 }
  0xba   : > { %v461_v22 = vpack.c.bf16 %v459_v21, %v459_v21  ;;  %v456_v24 = vpop.f32.mrf.mxu3 }
  0xbb   : > { %v443_v23 = vpop.f32.mrf.mxu2 }
  0xbc   : > { %680 = vmatmul.bf16.vlgmr.msrb.gmra.mxu1 %v461_v22  ;;  %706 = vmatmul.bf16.vlgmr.msrb.gmra.mxu3 %v461_v22 }
 0x130   : > { %v668_v27 = vpop.f32.mrf.mxu0 }
 0x131   : > { %v669_v28 = vadd.f32 %v668_v27, %v495_v26 }
 0x136   : > { %v694_v32 = vpop.f32.mrf.mxu2 }
 0x137   : > { %v695_v41 = vadd.f32 %v694_v32, %v496_v30 }
 0x138   : > { %v670_v38 = vpop.f32.mrf.mxu0 }
 0x139   : > { %v681_v34 = vpop.f32.mrf.mxu1 }
 0x13a   : > { %v682_v35 = vadd.f32 %v681_v34, %v669_v28 }
 0x13c   : > { %v711_v39 = vmax.f32 %v682_v35, 0.0 }
 0x13e   : > { %v718_v42 = vmul.f32 %v714_v37, %v711_v39  ;;  %v696_v47 = vpop.f32.mrf.mxu2 }
 0x13f   : > { %v707_v43 = vpop.f32.mrf.mxu3 }
 0x140   : > { %v725_v44 = vadd.f32 %v721_v40, %v718_v42  ;;  %v708_v45 = vadd.f32 %v707_v43, %v695_v41 }
 0x141   : > { %v683_v48 = vpop.f32.mrf.mxu1 }
 0x142   : > { %v727_v49 = vadd.f32 %v725_v44, %v1381_v31  ;;  %v712_v50 = vmax.f32 %v708_v45, 0.0 }
 0x144   : > { %729 = vst [vmem:[%s197_s29] sm:$0xff] %v727_v49  ;;  %v719_v52 = vmul.f32 %v715_v46, %v712_v50 }
 0x146   : > { %v726_v53 = vadd.f32 %v722_v51, %v719_v52 }
 0x147   : > { %v709_v54 = vpop.f32.mrf.mxu3 }
 0x148   : > { %v728_v55 = vadd.f32 %v726_v53, %v1389_v36 }
 0x14a   : > { %730 = vst [vmem:[%s197_s29 + $0x8] sm:$0xff] %v728_v55 }
 0x14b PF: > { %s14_s15 = sadd.s32 1, %s1136_s15  }
 0x14c   : > { %p11_p4 = scmp.ge.s32.totalorder %s14_s15, 6  }
 0x14e   :  { %13 = sbr.rel (!%p11_p4) target bundleno = 1 (0x1), region = 69 }

</bundles_post_ra>
